<compile_context>
chip_gen: v6e
topology: v6e:2x2x1
jax: 0.10.0
libtpu: 0.0.40
codegen_flags: <defaults>
</compile_context>

<pallas_src>
import jax
import jax.numpy as jnp
from jax.experimental import pallas as pl
from jax.experimental.pallas import tpu as pltpu


def _mlp_kernel(x1_ref, x2_ref, w1a_ref, w1b_ref, b1_ref,
                w2_ref, b2_ref, w3_ref, b3_ref, o_ref):
    # fc1 over the (virtual) concat: x1 @ W1a + x2 @ W1b + b1, then ReLU.
    h = (jnp.dot(x1_ref[...], w1a_ref[...], preferred_element_type=jnp.float32)
         + jnp.dot(x2_ref[...], w1b_ref[...], preferred_element_type=jnp.float32)
         + b1_ref[...])
    h = jnp.maximum(h, 0.0)
    # fc2 + ReLU
    h = jnp.dot(h, w2_ref[...], preferred_element_type=jnp.float32) + b2_ref[...]
    h = jnp.maximum(h, 0.0)
    # fc3 + tanh (tanh goes to the EUP slot, overlaps with VPU/MXU work)
    y = jnp.dot(h, w3_ref[...], preferred_element_type=jnp.float32) + b3_ref[...]
    o_ref[...] = jnp.tanh(y).astype(o_ref.dtype)


def latent_inv_dyn_mlp(x1, x2, w1, b1, w2, b2, w3, b3, *, block_b=256):
    """Fused forward pass of LatentInvDynMLP.

    x1, x2 : (B, ob_rep_dim)
    w1     : (2*ob_rep_dim, hidden)   (already transposed to (in, out))
    w2     : (hidden, hidden)
    w3     : (hidden, act_rep_dim)
    b*     : 1-D biases
    returns (B, act_rep_dim), same dtype as x1
    """
    B, D = x1.shape
    assert x2.shape == (B, D)
    assert w1.shape[0] == 2 * D
    H = w1.shape[1]
    A = w3.shape[1]

    # Split W1 so the concat never has to be materialized.
    w1a, w1b = w1[:D, :], w1[D:, :]
    b1r, b2r, b3r = b1.reshape(1, H), b2.reshape(1, H), b3.reshape(1, A)

    # Batch tiling: one full-extent block for small batches (no padding, grid
    # of 1), otherwise 8-aligned tiles with a zero-padded tail.
    if B <= block_b:
        bm, Bp = B, B
    else:
        bm = block_b
        Bp = pl.cdiv(B, bm) * bm
    x1p = x1 if Bp == B else jnp.pad(x1, ((0, Bp - B), (0, 0)))
    x2p = x2 if Bp == B else jnp.pad(x2, ((0, Bp - B), (0, 0)))
    n_blocks = Bp // bm

    batch_spec = pl.BlockSpec((bm, D), lambda i: (i, 0))
    resident = lambda shape: pl.BlockSpec(shape, lambda i: (0, 0))

    flops = 2 * Bp * (2 * D * H + H * H + H * A)
    bytes_accessed = 4 * (2 * Bp * D + 2 * D * H + H * H + H * A
                          + 2 * H + A + Bp * A)
    cost = pl.CostEstimate(flops=flops, transcendentals=Bp * A,
                           bytes_accessed=bytes_accessed)

    out = pl.pallas_call(
        _mlp_kernel,
        out_shape=jax.ShapeDtypeStruct((Bp, A), x1.dtype),
        grid_spec=pltpu.PrefetchScalarGridSpec(
            num_scalar_prefetch=0,
            grid=(n_blocks,),
            in_specs=[
                batch_spec,              # x1 tile
                batch_spec,              # x2 tile
                resident((D, H)),        # W1a  (resident in VMEM)
                resident((D, H)),        # W1b
                resident((1, H)),        # b1
                resident((H, H)),        # W2
                resident((1, H)),        # b2
                resident((H, A)),        # W3
                resident((1, A)),        # b3
            ],
            out_specs=pl.BlockSpec((bm, A), lambda i: (i, 0)),
        ),
        compiler_params=pltpu.CompilerParams(
            dimension_semantics=("parallel",)),
        cost_estimate=cost,
    )(x1p, x2p, w1a, w1b, b1r, w2, b2r, w3, b3r)
    return out[:B]


def _ref_mlp(x1, x2, w1, b1, w2, b2, w3, b3):
    x = jnp.concatenate([x1, x2], axis=1)
    h = jnp.maximum(x @ w1 + b1, 0.0)
    h = jnp.maximum(h @ w2 + b2, 0.0)
    return jnp.tanh(h @ w3 + b3)


if __name__ == "__main__":
    key = jax.random.PRNGKey(0)
    keys = jax.random.split(key, 16)

    def uniform(k, shape, bound):
        return jax.random.uniform(k, shape, jnp.float32, -bound, bound)

    # --- Small-shape check (single full-extent block, grid = 1) -------------
    B, ob_rep_dim, act_rep_dim, hidden_dim = 8, 16, 8, 32

    x1 = jax.random.normal(keys[0], (B, ob_rep_dim), jnp.float32)
    x2 = jax.random.normal(keys[1], (B, ob_rep_dim), jnp.float32)

    # PyTorch nn.Linear default init (U[-1/sqrt(fan_in), 1/sqrt(fan_in)]),
    # weights already transposed to (in, out) layout.
    bnd1 = 1.0 / (2 * ob_rep_dim) ** 0.5
    bnd2 = 1.0 / hidden_dim ** 0.5
    w1 = uniform(keys[2], (2 * ob_rep_dim, hidden_dim), bnd1)
    b1 = uniform(keys[3], (hidden_dim,), bnd1)
    w2 = uniform(keys[4], (hidden_dim, hidden_dim), bnd2)
    b2 = uniform(keys[5], (hidden_dim,), bnd2)
    w3 = uniform(keys[6], (hidden_dim, act_rep_dim), bnd2)
    b3 = uniform(keys[7], (act_rep_dim,), bnd2)

    out = jax.block_until_ready(
        latent_inv_dyn_mlp(x1, x2, w1, b1, w2, b2, w3, b3))
    ref = _ref_mlp(x1, x2, w1, b1, w2, b2, w3, b3)
    assert out.shape == (B, act_rep_dim) and out.dtype == x1.dtype
    assert jnp.allclose(out, ref, atol=1e-5, rtol=1e-5), \
        float(jnp.abs(out - ref).max())

    # --- Tiled/padded path check (grid > 1, ragged batch) -------------------
    B2, D2, H2, A2 = 300, 32, 128, 16
    x1b = jax.random.normal(keys[8], (B2, D2), jnp.float32)
    x2b = jax.random.normal(keys[9], (B2, D2), jnp.float32)
    c1 = 1.0 / (2 * D2) ** 0.5
    c2 = 1.0 / H2 ** 0.5
    w1b_ = uniform(keys[10], (2 * D2, H2), c1)
    b1b_ = uniform(keys[11], (H2,), c1)
    w2b_ = uniform(keys[12], (H2, H2), c2)
    b2b_ = uniform(keys[13], (H2,), c2)
    w3b_ = uniform(keys[14], (H2, A2), c2)
    b3b_ = uniform(keys[15], (A2,), c2)

    out2 = jax.block_until_ready(
        latent_inv_dyn_mlp(x1b, x2b, w1b_, b1b_, w2b_, b2b_, w3b_, b3b_,
                           block_b=128))
    ref2 = _ref_mlp(x1b, x2b, w1b_, b1b_, w2b_, b2b_, w3b_, b3b_)
    assert out2.shape == (B2, A2)
    assert jnp.allclose(out2, ref2, atol=1e-5, rtol=1e-5), \
        float(jnp.abs(out2 - ref2).max())

    print("KERNEL_OK")
</pallas_src>

<mosaic_0001>
module attributes {stable_mosaic.version = 11 : i64} {
  func.func @_mlp_kernel(%arg0: i32, %arg1: memref<8x16xf32, #tpu.memory_space<vmem>>, %arg2: memref<8x16xf32, #tpu.memory_space<vmem>>, %arg3: memref<16x32xf32, #tpu.memory_space<vmem>>, %arg4: memref<16x32xf32, #tpu.memory_space<vmem>>, %arg5: memref<1x32xf32, #tpu.memory_space<vmem>>, %arg6: memref<32x32xf32, #tpu.memory_space<vmem>>, %arg7: memref<1x32xf32, #tpu.memory_space<vmem>>, %arg8: memref<32x8xf32, #tpu.memory_space<vmem>>, %arg9: memref<1x8xf32, #tpu.memory_space<vmem>>, %arg10: memref<8x8xf32, #tpu.memory_space<vmem>>) attributes {dimension_semantics = [#tpu.dimension_semantics<parallel>], iteration_bounds = array<i64: 1>, scalar_prefetch = 0 : i64, scratch_operands = 0 : i64, tpu.core_type = #tpu.core_type<tc>, window_params = [{transform_indices = @transform_0, window_bounds = array<i64: 8, 16>}, {transform_indices = @transform_1, window_bounds = array<i64: 8, 16>}, {pipeline_mode = #tpu.pipeline_mode<synchronous>, transform_indices = @transform_2, window_bounds = array<i64: 16, 32>}, {pipeline_mode = #tpu.pipeline_mode<synchronous>, transform_indices = @transform_3, window_bounds = array<i64: 16, 32>}, {pipeline_mode = #tpu.pipeline_mode<synchronous>, transform_indices = @transform_4, window_bounds = array<i64: 1, 32>}, {pipeline_mode = #tpu.pipeline_mode<synchronous>, transform_indices = @transform_5, window_bounds = array<i64: 32, 32>}, {pipeline_mode = #tpu.pipeline_mode<synchronous>, transform_indices = @transform_6, window_bounds = array<i64: 1, 32>}, {pipeline_mode = #tpu.pipeline_mode<synchronous>, transform_indices = @transform_7, window_bounds = array<i64: 32, 8>}, {pipeline_mode = #tpu.pipeline_mode<synchronous>, transform_indices = @transform_8, window_bounds = array<i64: 1, 8>}, {transform_indices = @transform_9, window_bounds = array<i64: 8, 8>}]} {
    %c0 = arith.constant 0 : index
    %c0_0 = arith.constant 0 : index
    %0 = vector.load %arg1[%c0, %c0_0] : memref<8x16xf32, #tpu.memory_space<vmem>>, vector<8x16xf32>
    %c0_1 = arith.constant 0 : index
    %c0_2 = arith.constant 0 : index
    %1 = vector.load %arg3[%c0_1, %c0_2] : memref<16x32xf32, #tpu.memory_space<vmem>>, vector<16x32xf32>
    %cst = arith.constant dense<0.000000e+00> : vector<8x32xf32>
    %2 = tpu.matmul %0, %1, %cst {dimension_numbers = #tpu.dot_dimension_numbers<[1], [0], [0], [1], [0, 0, 1, 1], [], []>} : vector<8x16xf32>, vector<16x32xf32>, vector<8x32xf32> -> vector<8x32xf32>
    %c0_3 = arith.constant 0 : index
    %c0_4 = arith.constant 0 : index
    %3 = vector.load %arg2[%c0_3, %c0_4] : memref<8x16xf32, #tpu.memory_space<vmem>>, vector<8x16xf32>
    %c0_5 = arith.constant 0 : index
    %c0_6 = arith.constant 0 : index
    %4 = vector.load %arg4[%c0_5, %c0_6] : memref<16x32xf32, #tpu.memory_space<vmem>>, vector<16x32xf32>
    %cst_7 = arith.constant dense<0.000000e+00> : vector<8x32xf32>
    %5 = tpu.matmul %3, %4, %cst_7 {dimension_numbers = #tpu.dot_dimension_numbers<[1], [0], [0], [1], [0, 0, 1, 1], [], []>} : vector<8x16xf32>, vector<16x32xf32>, vector<8x32xf32> -> vector<8x32xf32>
    %6 = arith.addf %2, %5 : vector<8x32xf32>
    %c0_8 = arith.constant 0 : index
    %c0_9 = arith.constant 0 : index
    %7 = vector.load %arg5[%c0_8, %c0_9] : memref<1x32xf32, #tpu.memory_space<vmem>>, vector<1x32xf32>
    %8 = vector.broadcast %7 : vector<1x32xf32> to vector<8x32xf32>
    %9 = arith.addf %6, %8 : vector<8x32xf32>
    %cst_10 = arith.constant 0.000000e+00 : f32
    %10 = vector.broadcast %cst_10 : f32 to vector<8x32xf32>
    %11 = arith.maximumf %9, %10 : vector<8x32xf32>
    %c0_11 = arith.constant 0 : index
    %c0_12 = arith.constant 0 : index
    %12 = vector.load %arg6[%c0_11, %c0_12] : memref<32x32xf32, #tpu.memory_space<vmem>>, vector<32x32xf32>
    %cst_13 = arith.constant dense<0.000000e+00> : vector<8x32xf32>
    %13 = tpu.matmul %11, %12, %cst_13 {dimension_numbers = #tpu.dot_dimension_numbers<[1], [0], [0], [1], [0, 0, 1, 1], [], []>} : vector<8x32xf32>, vector<32x32xf32>, vector<8x32xf32> -> vector<8x32xf32>
    %c0_14 = arith.constant 0 : index
    %c0_15 = arith.constant 0 : index
    %14 = vector.load %arg7[%c0_14, %c0_15] : memref<1x32xf32, #tpu.memory_space<vmem>>, vector<1x32xf32>
    %15 = vector.broadcast %14 : vector<1x32xf32> to vector<8x32xf32>
    %16 = arith.addf %13, %15 : vector<8x32xf32>
    %cst_16 = arith.constant 0.000000e+00 : f32
    %17 = vector.broadcast %cst_16 : f32 to vector<8x32xf32>
    %18 = arith.maximumf %16, %17 : vector<8x32xf32>
    %c0_17 = arith.constant 0 : index
    %c0_18 = arith.constant 0 : index
    %19 = vector.load %arg8[%c0_17, %c0_18] : memref<32x8xf32, #tpu.memory_space<vmem>>, vector<32x8xf32>
    %cst_19 = arith.constant dense<0.000000e+00> : vector<8x8xf32>
    %20 = tpu.matmul %18, %19, %cst_19 {dimension_numbers = #tpu.dot_dimension_numbers<[1], [0], [0], [1], [0, 0, 1, 1], [], []>} : vector<8x32xf32>, vector<32x8xf32>, vector<8x8xf32> -> vector<8x8xf32>
    %c0_20 = arith.constant 0 : index
    %c0_21 = arith.constant 0 : index
    %21 = vector.load %arg9[%c0_20, %c0_21] : memref<1x8xf32, #tpu.memory_space<vmem>>, vector<1x8xf32>
    %22 = vector.broadcast %21 : vector<1x8xf32> to vector<8x8xf32>
    %23 = arith.addf %20, %22 : vector<8x8xf32>
    %24 = math.tanh %23 : vector<8x8xf32>
    %c0_22 = arith.constant 0 : index
    %c0_23 = arith.constant 0 : index
    %25 = vector.load %arg10[%c0_22, %c0_23] : memref<8x8xf32, #tpu.memory_space<vmem>>, vector<8x8xf32>
    tpu.vector_store %arg10[%c0_22, %c0_23], %24 {strides = array<i32>} : memref<8x8xf32, #tpu.memory_space<vmem>>, vector<8x8xf32>,
    return
  }
  func.func @transform_0(%arg0: i32) -> (i32, i32) {
    %c0_i32 = arith.constant 0 : i32
    %c0_i32_0 = arith.constant 0 : i32
    return %arg0, %c0_i32 : i32, i32
  }
  func.func @transform_1(%arg0: i32) -> (i32, i32) {
    %c0_i32 = arith.constant 0 : i32
    %c0_i32_0 = arith.constant 0 : i32
    return %arg0, %c0_i32 : i32, i32
  }
  func.func @transform_2(%arg0: i32) -> (i32, i32) {
    %c0_i32 = arith.constant 0 : i32
    %c0_i32_0 = arith.constant 0 : i32
    %c0_i32_1 = arith.constant 0 : i32
    return %c0_i32, %c0_i32_0 : i32, i32
  }
  func.func @transform_3(%arg0: i32) -> (i32, i32) {
    %c0_i32 = arith.constant 0 : i32
    %c0_i32_0 = arith.constant 0 : i32
    %c0_i32_1 = arith.constant 0 : i32
    return %c0_i32, %c0_i32_0 : i32, i32
  }
  func.func @transform_4(%arg0: i32) -> (i32, i32) {
    %c0_i32 = arith.constant 0 : i32
    %c0_i32_0 = arith.constant 0 : i32
    %c0_i32_1 = arith.constant 0 : i32
    return %c0_i32, %c0_i32_0 : i32, i32
  }
  func.func @transform_5(%arg0: i32) -> (i32, i32) {
    %c0_i32 = arith.constant 0 : i32
    %c0_i32_0 = arith.constant 0 : i32
    %c0_i32_1 = arith.constant 0 : i32
    return %c0_i32, %c0_i32_0 : i32, i32
  }
  func.func @transform_6(%arg0: i32) -> (i32, i32) {
    %c0_i32 = arith.constant 0 : i32
    %c0_i32_0 = arith.constant 0 : i32
    %c0_i32_1 = arith.constant 0 : i32
    return %c0_i32, %c0_i32_0 : i32, i32
  }
  func.func @transform_7(%arg0: i32) -> (i32, i32) {
    %c0_i32 = arith.constant 0 : i32
    %c0_i32_0 = arith.constant 0 : i32
    %c0_i32_1 = arith.constant 0 : i32
    return %c0_i32, %c0_i32_0 : i32, i32
  }
  func.func @transform_8(%arg0: i32) -> (i32, i32) {
    %c0_i32 = arith.constant 0 : i32
    %c0_i32_0 = arith.constant 0 : i32
    %c0_i32_1 = arith.constant 0 : i32
    return %c0_i32, %c0_i32_0 : i32, i32
  }
  func.func @transform_9(%arg0: i32) -> (i32, i32) {
    %c0_i32 = arith.constant 0 : i32
    %c0_i32_0 = arith.constant 0 : i32
    return %arg0, %c0_i32 : i32, i32
  }
}

</mosaic_0001>

<bundles_post_ra>
// kernel: tpu_custom_call.1
= control target key start
LH: loop header
LB: loop body
LE: loop exit
PB: predicated region body
PF: predicated region fallthrough
CT: control target
= control target key end

     0   :  { %14 = vsyncpa [#allocation3], 0  ;;  %s691_s0 = inlined_call_operand.hbm [shape: f32[8,16], index: 0, kind: input, shape index: {}]   ;;  %s692_s1 = inlined_call_operand.hbm [shape: f32[8,16], index: 1, kind: input, shape index: {}]   ;;  %s693_s2 = inlined_call_operand.vmem [shape: f32[16,32], index: 2, kind: input, shape index: {}]   ;;  %s694_s3 = inlined_call_operand.hbm [shape: f32[16,32], index: 3, kind: input, shape index: {}]   ;;  %s695_s4 = inlined_call_operand.vmem [shape: f32[1,32], index: 4, kind: input, shape index: {}]   ;;  %s696_s5 = inlined_call_operand.vmem [shape: f32[32,32], index: 5, kind: input, shape index: {}]   ;;  %s697_s6 = inlined_call_operand.vmem [shape: f32[1,32], index: 6, kind: input, shape index: {}]   ;;  %s698_s7 = inlined_call_operand.vmem [shape: f32[32,8], index: 7, kind: input, shape index: {}]   ;;  %s699_s8 = inlined_call_operand.vmem [shape: f32[1,8], index: 8, kind: input, shape index: {}]   ;;  %s700_s9 = inlined_call_operand.hbm [shape: f32[8,8], index: 9, kind: output, shape index: {}]  }
   0x1   :  { %15 = vsyncpa [#allocation6], 0 }
   0x2   :  { %16 = vsyncpa [#allocation4], 0  ;;  %s576_s30 = smov [#allocation5]   ;;  %s577_s11 = smov [#allocation2]  }
   0x3   :  { %s33_s10 = sshll.u32 %s576_s30, 4  ;;  %s23_s12 = sshll.u32 %s577_s11, 4  ;;  %s34_s10 = int_to_ptr.vmem [resolvable:$true] %s33_s10  ;;  %s24_s12 = int_to_ptr.vmem [resolvable:$true] %s23_s12 }
   0x4   :  { %s498_s13 = scalar_lea.vmem %s34_s10, 128  ;;  %p503_p1 = scmp.lt.s32.totalorder %s34_s10, %s34_s10 }
   0x5   :  { %p499_p0 = scmp.ne.s32.totalorder %s34_s10, %s498_s13  ;;  %p504_p2 = scmp.lt.s32.totalorder %s498_s13, %s498_s13 }
   0x7   :  { %p505_p3 = por %p504_p2, %p503_p1 }
   0x9   :  { %p506_p4 = pnand %p505_p3, %p499_p0 }
   0xb   :  { %509 = shalt.err (!%p506_p4)
}
   0xc   :  { %36 = dma.hbm_to_vmem [thread:$0]  %s692_s1, 128, %s34_s10, [#allocation6]  }
   0xd   :  { %s518_s16 = scalar_lea.vmem %s24_s12, 128  ;;  %p523_p6 = scmp.lt.s32.totalorder %s24_s12, %s24_s12 }
   0xe   :  { %p519_p5 = scmp.ne.s32.totalorder %s24_s12, %s518_s16  ;;  %p524_p7 = scmp.lt.s32.totalorder %s518_s16, %s518_s16 }
  0x10   :  { %p525_p8 = por %p524_p7, %p523_p6 }
  0x12   :  { %p526_p9 = pnand %p525_p8, %p519_p5 }
  0x14   :  { %529 = shalt.err (!%p526_p9)
}
  0x15   :  { %26 = dma.hbm_to_vmem [thread:$0]  %s691_s0, 128, %s24_s12, [#allocation3]  }
  0x16   :  { %s578_s19 = smov [#allocation7]  }
  0x17   :  { %s44_s20 = sshll.u32 %s578_s19, 4  ;;  %s45_s20 = int_to_ptr.vmem [resolvable:$true] %s44_s20 }
  0x18   :  { %s538_s21 = scalar_lea.vmem %s45_s20, 256  ;;  %p543_p11 = scmp.lt.s32.totalorder %s45_s20, %s45_s20 }
  0x19   :  { %p539_p10 = scmp.ne.s32.totalorder %s45_s20, %s538_s21  ;;  %p544_p12 = scmp.lt.s32.totalorder %s538_s21, %s538_s21 }
  0x1b   :  { %p545_p13 = por %p544_p12, %p543_p11 }
  0x1d   :  { %p546_p0 = pnand %p545_p13, %p539_p10 }
  0x1f   :  { %549 = shalt.err (!%p546_p0)
}
  0x20   :  { %s579_s1 = smov 128   ;;  %s580_s22 = smov 8  }
  0x21   :  { %50 = dma.hbm_to_vmem [thread:$0]  %s694_s3, 256, %s45_s20, [#allocation6], %s579_s1, %s579_s1, %s580_s22  }
  0x22   :  { %570 = dma.done.wait [#allocation3], 128  }
  0x23   :  { %571 = vsyncadd [#allocation3], 4294967168 }
  0x24   :  { %572 = dma.done.wait [#allocation6], 384  }
  0x25   :  { %573 = vsyncadd [#allocation6], 4294966912  ;;  %v581_v0 = vmov 0.0   ;;  %vm582_vm0 = vmmov 0   ;;  %v75_v1 = vld [vmem:[#allocation7 + $0x8] sm:$0xff]  ;;  %v72_v2 = vld [vmem:[%s693_s2 + $0x8] sm:$0xff] }
  0x26   :  { %444 = vmatprep.subr.mxu0 %v581_v0  ;;  %451 = vmatprep.subr.mxu1 %v581_v0  ;;  %v74_v3 = vld [vmem:[#allocation7] sm:$0xff]  ;;  %v71_v4 = vld [vmem:[%s693_s2] sm:$0xff]  ;;  %v73_v5 = vld [vmem:[#allocation5] sm:$0xff]  ;;  %vm76_vm1 = vcmask 130048   ;;  %vm243_vm2 = vcmask 261120   ;;  %vm403_vm3 = vcmask 64512  }
  0x27   :  { %448 = vmatprep.mubr.msk.f32.mxu0 %vm582_vm0, %v581_v0  ;;  %455 = vmatprep.mubr.msk.f32.mxu1 %vm582_vm0, %v581_v0  ;;  %v70_v6 = vld [vmem:[#allocation2] sm:$0xff]  ;;  %v235_v7 = vld [vmem:[%s696_s5 + $0x18] sm:$0xff]  ;;  %v234_v8 = vld [vmem:[%s696_s5 + $0x10] sm:$0xff] }
  0x28   :  { %445 = vmatpush3.msra.mxu0 %v75_v1  ;;  %452 = vmatpush3.msra.mxu1 %v72_v2  ;;  %v233_v9 = vld [vmem:[%s696_s5 + $0x8] sm:$0xff]  ;;  %v232_v10 = vld [vmem:[%s696_s5] sm:$0xff]  ;;  %v321_v11 = vld [vmem:[%s698_s7 + $0x18] sm:$0xff] }
  0x29   :  { %446 = vmatprep.subr.mxu0 %v581_v0  ;;  %453 = vmatprep.subr.mxu1 %v581_v0  ;;  %v423_v14 = vld [vmem:[%s695_s4] ss:$0 sm:$0xff]  ;;  %v320_v20 = vld [vmem:[%s698_s7 + $0x10] sm:$0xff]  ;;  %v319_v21 = vld [vmem:[%s698_s7 + $0x8] sm:$0xff] }
  0x2a   :  { %447 = vmatpush3.msra.mxu0 %v74_v3  ;;  %454 = vmatpush3.msra.mxu1 %v71_v4  ;;  %v318_v22 = vld [vmem:[%s698_s7] sm:$0xff]  ;;  %s583_s7 = smov [#allocation8]  }
  0x2b   :  { %449 = vmatmul.mubr.msk.f32.vlgmr.msra.gmra.mxu0 %vm76_vm1, %v73_v5  ;;  %456 = vmatmul.mubr.msk.f32.vlgmr.msra.gmra.mxu1 %vm76_vm1, %v70_v6  ;;  %v424_v23 = vld [vmem:[%s697_s6] ss:$0 sm:$0xff]  ;;  %s411_s24 = sshll.u32 %s583_s7, 4  ;;  %s412_s24 = int_to_ptr.vmem [resolvable:$true] %s411_s24 }
  0x2c   :  { %458 = vmatprep.subr.mxu0 %v581_v0  ;;  %466 = vmatprep.mubr.msk.f32.mxu0 %vm582_vm0, %v581_v0  ;;  %v426_v28 = vld [vmem:[%s699_s8] ss:$0 sm:$0xff]  ;;  %s550_s6 = scalar_lea.vmem %s412_s24, 128  ;;  %p555_p2 = scmp.lt.s32.totalorder %s412_s24, %s412_s24 }
  0x2d   :  { %469 = vmatprep.subr.mxu1 %v581_v0  ;;  %477 = vmatprep.mubr.msk.f32.mxu1 %vm582_vm0, %v581_v0  ;;  %p551_p1 = scmp.ne.s32.totalorder %s412_s24, %s550_s6  ;;  %p556_p3 = scmp.lt.s32.totalorder %s550_s6, %s550_s6 }
  0x2e   :  { %459 = vmatpush3.msra.mxu0 %v235_v7  ;;  %470 = vmatpush3.msra.mxu1 %v321_v11 }
  0x2f   :  { %460 = vmatprep.subr.mxu0 %v581_v0  ;;  %471 = vmatprep.subr.mxu1 %v581_v0  ;;  %p557_p4 = por %p556_p3, %p555_p2 }
  0x30   :  { %461 = vmatpush3.msra.mxu0 %v234_v8  ;;  %472 = vmatpush3.msra.mxu1 %v320_v20 }
  0x31   :  { %462 = vmatprep.subr.mxu0 %v581_v0  ;;  %473 = vmatprep.subr.mxu1 %v581_v0  ;;  %p558_p5 = pnand %p557_p4, %p551_p1 }
  0x32   :  { %463 = vmatpush3.msra.mxu0 %v233_v9  ;;  %474 = vmatpush3.msra.mxu1 %v319_v21 }
  0x33   :  { %464 = vmatprep.subr.mxu0 %v581_v0  ;;  %475 = vmatprep.subr.mxu1 %v581_v0 }
  0x34   :  { %465 = vmatpush3.msra.mxu0 %v232_v10  ;;  %476 = vmatpush3.msra.mxu1 %v318_v22 }
  0xeb   :  { %v146_v12 = vpop.f32.mrf.mxu0  ;;  %v219_v13 = vpop.f32.mrf.mxu1 }
  0xec   :  { %v220_v15 = vadd.f32 %v219_v13, %v146_v12 }
  0xed   :  { %v450_v16 = vpop.f32.mrf.mxu0  ;;  %v457_v17 = vpop.f32.mrf.mxu1 }
  0xee   :  { %v230_v18 = vadd.f32 %v423_v14, %v220_v15 }
  0xf0   :  { %v231_v19 = vmax.f32 %v230_v18, 0.0 }
  0xf2   :  { %467 = vmatmul.mubr.msk.f32.vlgmr.msra.gmra.mxu0 %vm243_vm2, %v231_v19 }
 0x1b2   :  { %v313_v24 = vpop.f32.mrf.mxu0 }
 0x1b3   :  { %v314_v25 = vadd.f32 %v424_v23, %v313_v24 }
 0x1b4   :  { %v468_v26 = vpop.f32.mrf.mxu0 }
 0x1b5   :  { %v317_v27 = vmax.f32 %v314_v25, 0.0 }
 0x1b7   :  { %478 = vmatmul.mubr.msk.f32.vlgmr.msra.gmra.mxu1 %vm243_vm2, %v317_v27 }
 0x277   :  { %v398_v29 = vpop.f32.mrf.mxu1 }
 0x278   :  { %v399_v30 = vadd.f32 %v426_v28, %v398_v29 }
 0x279   :  { %v479_v31 = vpop.f32.mrf.mxu1 }
 0x27a   :  { %488 = vtanh.f32 %v399_v30 }
 0x287   :  { %v489_v32 = vpop.eup %488 }
 0x288   :  { %404 = vst.msk [vmem:[#allocation8] sm:$0xff] %vm403_vm3, %v489_v32 }
 0x289   :  { %561 = shalt.err (!%p558_p5)
}
 0x28a   :  { %414 = dma.vmem_to_hbm [thread:$0]  %s412_s24, 128, %s700_s9, [#allocation4]  }
 0x28b   :  { %574 = dma.done.wait [#allocation4], 128  }
 0x28c   :  { %575 = vsyncadd [#allocation4], 4294967168 }
 0x28d   :  { %418 = vsyncpa [#allocation3], 1 }
 0x28e   :  { %419 = vsyncpa [#allocation6], 1 }
 0x28f   :  { %420 = vsyncpa [#allocation4], 1 }

</bundles_post_ra>
